<compile_context>
chip_gen: v7x
topology: tpu7x:2x2x1
jax: 0.10.0
libtpu: 0.0.40
codegen_flags: <defaults>
</compile_context>

<pallas_src>
import math
import jax
import jax.numpy as jnp
from jax.experimental import pallas as pl
from jax.experimental.pallas import tpu as pltpu

LANE = 128


def _round_up(v, m):
    return (v + m - 1) // m * m


def _is_v5e(device_kind):
    kind = (device_kind or "").lower()
    return ("v5 lite" in kind) or ("v5lite" in kind) or ("v5e" in kind)


def _pick_vmem_limit():
    """Generation-aware VMEM limit with headroom for double buffering."""
    try:
        cap = int(pltpu.get_tpu_info().vmem_capacity_bytes)
    except Exception:
        return 48 << 20  # safe on every generation (v7x physical is 64 MiB)
    return max(32 << 20, min(cap * 3 // 4, 96 << 20))


def _tile_candidates(total, cap=None):
    """Multiples of LANE that divide `total`, descending (total % LANE == 0)."""
    units = total // LANE
    cands = [d * LANE for d in range(units, 0, -1) if units % d == 0]
    if cap is not None:
        capped = [c for c in cands if c <= cap]
        cands = capped or [cands[-1]]
    return cands


# ---------------- projection kernels: out = a @ W (+ bias) ----------------
def _project_kernel(a_ref, w_ref, o_ref):
    o_ref[...] = jnp.dot(
        a_ref[...].astype(w_ref.dtype), w_ref[...],
        preferred_element_type=jnp.float32,
    ).astype(o_ref.dtype)


def _project_bias_kernel(a_ref, w_ref, b_ref, o_ref):
    acc = jnp.dot(
        a_ref[...].astype(w_ref.dtype), w_ref[...],
        preferred_element_type=jnp.float32,
    )
    o_ref[...] = (acc + b_ref[...]).astype(o_ref.dtype)


# ---------------- aggregation kernels: out = adj @ s (+ bias) ----------------
def _make_agg_kernel(resident, tk, with_bias):
    """Accumulate directly into the resident f32 output block over k (no scratch)."""

    def kernel(*refs):
        if with_bias:
            adj_ref, s_ref, b_ref, o_ref = refs
        else:
            adj_ref, s_ref, o_ref = refs
        k = pl.program_id(2)

        if resident:
            # Whole support is resident in VMEM (DMA'd once); slice the k-slab.
            row = pl.multiple_of(k * tk, LANE)
            s_blk = s_ref[pl.ds(row, tk), :]
        else:
            s_blk = s_ref[...]

        # bf16 x bf16 (or f32 x f32 in the escape hatch), f32 accumulation.
        acc = jnp.dot(adj_ref[...], s_blk, preferred_element_type=jnp.float32)

        @pl.when(k == 0)
        def _():
            o_ref[...] = acc

        @pl.when(k > 0)
        def _():
            o_ref[...] += acc

        if with_bias:
            @pl.when(k == pl.num_programs(2) - 1)
            def _():
                o_ref[...] += b_ref[...]

    return kernel


# ---------------- tile / residency pickers ----------------
def _pick_agg_config(n_pad, feat_pad, adj_bytes, sup_bytes, budget, device_kind):
    v5e = _is_v5e(device_kind)
    tm_cap = 128 if v5e else 256
    if n_pad >= 2 * LANE:
        tm_cap = min(tm_cap, n_pad // 2)  # >=2 row tiles -> both v7x TCs busy
    tk_cap_stream = 256 if v5e else 512

    def est(tm, tk, tf, resident):
        adj_v = 2 * tm * tk * adj_bytes                               # 2-deep adj
        sup_v = (n_pad * feat_pad if resident else 2 * tk * tf) * sup_bytes
        out_v = 2 * tm * tf * 4                                       # f32 out block
        return adj_v + sup_v + out_v + feat_pad * 4

    # Preferred: support resident in VMEM (read from HBM exactly once).
    for tm in _tile_candidates(n_pad, tm_cap):
        for tk in _tile_candidates(n_pad):
            if est(tm, tk, feat_pad, True) <= budget:
                return tm, tk, feat_pad, True
    # Fallback: stream support along k; tile the feature axis only if needed.
    for tf in _tile_candidates(feat_pad):
        for tm in _tile_candidates(n_pad, tm_cap):
            for tk in _tile_candidates(n_pad, tk_cap_stream):
                if est(tm, tk, tf, False) <= budget:
                    return tm, tk, tf, False
    # Last resort: minimum tiles (pads are LANE multiples, so these divide).
    return LANE, LANE, LANE, False


def _pick_proj_config(n_pad, k_dim, f_pad, a_bytes, w_bytes, o_bytes, budget):
    # TODO(synk): the contraction dim (k_dim) is kept whole in VMEM; tile it too
    # if extremely wide GCN layers ever exceed the budget at tms=tfp=128.
    def est(tms, tfp):
        return (2 * tms * k_dim * a_bytes + 2 * k_dim * tfp * w_bytes
                + 2 * tms * tfp * o_bytes + f_pad * 4)

    for tms in _tile_candidates(n_pad, 512):
        for tfp in _tile_candidates(f_pad):
            if est(tms, tfp) <= budget:
                return tms, tfp
    return LANE, LANE


# ---------------- pallas_call wrappers ----------------
def _project(a_p, w_p, bias_p, *, out_dtype, budget, vmem_limit):
    """out = a_p @ w_p (+ bias_p); a_p:(n_pad,k), w_p:(k,f_pad), bias_p:(1,f_pad)|None."""
    n_pad, k_dim = a_p.shape
    _, f_pad = w_p.shape
    o_bytes = jnp.dtype(out_dtype).itemsize
    tms, tfp = _pick_proj_config(n_pad, k_dim, f_pad,
                                 a_p.dtype.itemsize, w_p.dtype.itemsize,
                                 o_bytes, budget)
    grid = (n_pad // tms, f_pad // tfp)

    in_specs = [pl.BlockSpec((tms, k_dim), lambda i, j: (i, 0)),
                pl.BlockSpec((k_dim, tfp), lambda i, j: (0, j))]
    args = [a_p, w_p]
    if bias_p is not None:
        in_specs.append(pl.BlockSpec((1, tfp), lambda i, j: (0, j)))
        args.append(bias_p)
        kernel = _project_bias_kernel
    else:
        kernel = _project_kernel

    w_reads = grid[0] if grid[1] > 1 else 1
    cost = pl.CostEstimate(
        flops=2 * n_pad * k_dim * f_pad,
        transcendentals=0,
        bytes_accessed=(a_p.dtype.itemsize * n_pad * k_dim
                        + w_p.dtype.itemsize * k_dim * f_pad * w_reads
                        + o_bytes * n_pad * f_pad),
    )
    return pl.pallas_call(
        kernel,
        out_shape=jax.ShapeDtypeStruct((n_pad, f_pad), out_dtype),
        grid_spec=pltpu.PrefetchScalarGridSpec(
            num_scalar_prefetch=0,
            grid=grid,
            in_specs=in_specs,
            out_specs=pl.BlockSpec((tms, tfp), lambda i, j: (i, j)),
        ),
        compiler_params=pltpu.CompilerParams(
            dimension_semantics=("parallel", "parallel"),
            vmem_limit_bytes=vmem_limit,
        ),
        cost_estimate=cost,
    )(*args)


def _aggregate(adj_p, sup_p, bias_p, *, budget, vmem_limit, device_kind):
    """out[f32] = adj_p @ sup_p (+ bias_p); all operands lane-padded."""
    n_pad = adj_p.shape[0]
    feat_pad = sup_p.shape[1]
    adj_bytes = adj_p.dtype.itemsize
    sup_bytes = sup_p.dtype.itemsize
    tm, tk, tf, resident = _pick_agg_config(
        n_pad, feat_pad, adj_bytes, sup_bytes, budget, device_kind)
    grid = (n_pad // tm, feat_pad // tf, n_pad // tk)

    adj_spec = pl.BlockSpec((tm, tk), lambda i, j, k: (i, k))
    if _is_v5e(device_kind) and tk <= 256:
        # Deeper adj pipelining on the most memory-bound generation.
        try:
            adj_spec = pl.BlockSpec((tm, tk), lambda i, j, k: (i, k),
                                    pipeline_mode=pl.Buffered(3))
        except TypeError:
            pass

    if resident:
        sup_spec = pl.BlockSpec((n_pad, feat_pad), lambda i, j, k: (0, 0))
    else:
        sup_spec = pl.BlockSpec((tk, tf), lambda i, j, k: (k, j))
    out_spec = pl.BlockSpec((tm, tf), lambda i, j, k: (i, j))

    in_specs = [adj_spec, sup_spec]
    args = [adj_p, sup_p]
    if bias_p is not None:
        in_specs.append(pl.BlockSpec((1, tf), lambda i, j, k: (0, j)))
        args.append(bias_p)

    kernel = _make_agg_kernel(resident, tk, bias_p is not None)

    adj_reads = grid[1]                      # 1 unless the feature axis is tiled
    sup_reads = 1 if resident else grid[0]
    cost = pl.CostEstimate(
        flops=2 * n_pad * n_pad * feat_pad,
        transcendentals=0,
        bytes_accessed=(adj_bytes * n_pad * n_pad * adj_reads
                        + sup_bytes * n_pad * feat_pad * sup_reads
                        + 4 * n_pad * feat_pad),
    )
    return pl.pallas_call(
        kernel,
        out_shape=jax.ShapeDtypeStruct((n_pad, feat_pad), jnp.float32),
        grid_spec=pltpu.PrefetchScalarGridSpec(
            num_scalar_prefetch=0,
            grid=grid,
            in_specs=in_specs,
            out_specs=out_spec,
        ),
        compiler_params=pltpu.CompilerParams(
            dimension_semantics=("parallel", "parallel", "arbitrary"),
            vmem_limit_bytes=vmem_limit,
        ),
        cost_estimate=cost,
    )(*args)


# ---------------- public entry point ----------------
def graph_convolution(x, weight, adj, bias=None, *, adj_in_bf16=True):
    """GCN layer: adj @ (x @ weight) (+ bias), computed with Pallas TPU kernels.

    adj_in_bf16=False is the f32 escape hatch (all operands stay f32).
    """
    n, in_f = x.shape
    in_f2, out_f = weight.shape
    assert in_f == in_f2
    assert adj.shape == (n, n)

    work_dtype = jnp.bfloat16 if adj_in_bf16 else jnp.float32

    n_pad = _round_up(n, LANE)
    f_pad = _round_up(out_f, LANE)

    device_kind = jax.devices()[0].device_kind
    vmem_limit = _pick_vmem_limit()
    budget = int(vmem_limit * 0.8)  # headroom for compiler scratch / semaphores

    # adj: cast narrow FIRST, then pad (wrapper copies happen in 2-byte dtype).
    adj_w = adj if adj.dtype == work_dtype else adj.astype(work_dtype)
    if n_pad != n:
        adj_w = jnp.pad(adj_w, ((0, n_pad - n), (0, n_pad - n)))

    bias_p = None
    if bias is not None:
        bias_p = bias.astype(jnp.float32)
        if f_pad != out_f:
            bias_p = jnp.pad(bias_p, (0, f_pad - out_f))
        bias_p = bias_p.reshape(1, f_pad)

    # Put the smaller feature width next to the N^2 operand:
    #   out_f <= in_f :  out = adj @ (x @ W)   (project, then aggregate)
    #   out_f >  in_f :  out = (adj @ x) @ W   (aggregate, then project)
    if out_f <= in_f:
        x_w = x if x.dtype == work_dtype else x.astype(work_dtype)
        if n_pad != n:
            x_w = jnp.pad(x_w, ((0, n_pad - n), (0, 0)))
        w_w = weight if weight.dtype == work_dtype else weight.astype(work_dtype)
        if f_pad != out_f:
            w_w = jnp.pad(w_w, ((0, 0), (0, f_pad - out_f)))
        support = _project(x_w, w_w, None, out_dtype=work_dtype,
                           budget=budget, vmem_limit=vmem_limit)
        out_p = _aggregate(adj_w, support, bias_p,
                           budget=budget, vmem_limit=vmem_limit,
                           device_kind=device_kind)
    else:
        in_pad = _round_up(in_f, LANE)
        x_w = x if x.dtype == work_dtype else x.astype(work_dtype)
        if n_pad != n or in_pad != in_f:
            x_w = jnp.pad(x_w, ((0, n_pad - n), (0, in_pad - in_f)))
        w_w = weight if weight.dtype == work_dtype else weight.astype(work_dtype)
        if in_pad != in_f or f_pad != out_f:
            w_w = jnp.pad(w_w, ((0, in_pad - in_f), (0, f_pad - out_f)))
        agg = _aggregate(adj_w, x_w, None,
                         budget=budget, vmem_limit=vmem_limit,
                         device_kind=device_kind)            # (n_pad, in_pad) f32
        out_p = _project(agg, w_w, bias_p, out_dtype=jnp.float32,
                         budget=budget, vmem_limit=vmem_limit)

    return out_p[:n, :out_f]


def init_graph_convolution_params(key, in_features, out_features, bias=True):
    """Deterministic replica of reset_parameters(): uniform(-stdv, stdv)."""
    stdv = 1.0 / math.sqrt(in_features)
    kw, kb = jax.random.split(key)
    weight = jax.random.uniform(
        kw, (in_features, out_features), minval=-stdv, maxval=stdv, dtype=jnp.float32
    )
    b = None
    if bias:
        b = jax.random.uniform(
            kb, (out_features,), minval=-stdv, maxval=stdv, dtype=jnp.float32
        )
    return weight, b


if __name__ == "__main__":
    key = jax.random.PRNGKey(0)
    k_x, k_adj, k_p1, k_p2 = jax.random.split(key, 4)

    N = 64  # graph nodes

    adj_raw = jax.random.uniform(k_adj, (N, N), dtype=jnp.float32)
    adj = (adj_raw + adj_raw.T) / 2.0

    # ---- case 1: out_features <= in_features  ->  adj @ (x @ W) ----
    IN1, OUT1 = 32, 16
    x1 = jax.random.normal(k_x, (N, IN1), dtype=jnp.float32)
    w1, b1 = init_graph_convolution_params(k_p1, IN1, OUT1, bias=True)

    out1 = jax.block_until_ready(graph_convolution(x1, w1, adj, b1))
    ref1 = adj @ (x1 @ w1) + b1
    assert out1.shape == (N, OUT1)
    # adj / x / W travel as bf16 in the kernels (memory-bound optimization);
    # accumulation stays f32 -> tolerance reflects bf16 operand rounding.
    assert jnp.allclose(out1, ref1, atol=5e-2, rtol=5e-2)

    # no-bias path (separate kernel variant, no synthetic zero-bias DMA)
    out1_nb = jax.block_until_ready(graph_convolution(x1, w1, adj, None))
    assert jnp.allclose(out1_nb, adj @ (x1 @ w1), atol=5e-2, rtol=5e-2)

    # ---- case 2: out_features > in_features  ->  (adj @ x) @ W ----
    IN2, OUT2 = 16, 48
    x2 = jax.random.normal(k_x, (N, IN2), dtype=jnp.float32)
    w2, b2 = init_graph_convolution_params(k_p2, IN2, OUT2, bias=True)
    out2 = jax.block_until_ready(graph_convolution(x2, w2, adj, b2))
    ref2 = adj @ (x2 @ w2) + b2
    assert out2.shape == (N, OUT2)
    assert jnp.allclose(out2, ref2, atol=5e-2, rtol=5e-2)

    # ---- f32 escape hatch (adj_in_bf16=False); both sides use TPU default
    # matmul precision, so tolerance stays moderate rather than bit-exact. ----
    out1_f32 = jax.block_until_ready(
        graph_convolution(x1, w1, adj, b1, adj_in_bf16=False))
    assert jnp.allclose(out1_f32, ref1, atol=5e-2, rtol=5e-2)

    print("KERNEL_OK")
</pallas_src>

<mosaic_0001>
module attributes {stable_mosaic.version = 11 : i64} {
  func.func @_project_kernel(%arg0: i32, %arg1: i32, %arg2: memref<128x32xbf16, #tpu.memory_space<vmem>>, %arg3: memref<32x128xbf16, #tpu.memory_space<vmem>>, %arg4: memref<128x128xbf16, #tpu.memory_space<vmem>>) attributes {dimension_semantics = [#tpu.dimension_semantics<parallel>, #tpu.dimension_semantics<parallel>], iteration_bounds = array<i64: 1, 1>, scalar_prefetch = 0 : i64, scratch_operands = 0 : i64, tpu.core_type = #tpu.core_type<tc>, window_params = [{transform_indices = @transform_0, window_bounds = array<i64: 128, 32>}, {transform_indices = @transform_1, window_bounds = array<i64: 32, 128>}, {transform_indices = @transform_2, window_bounds = array<i64: 128, 128>}]} {
    %c0 = arith.constant 0 : index
    %c0_0 = arith.constant 0 : index
    %0 = vector.load %arg2[%c0, %c0_0] : memref<128x32xbf16, #tpu.memory_space<vmem>>, vector<128x32xbf16>
    %c0_1 = arith.constant 0 : index
    %c0_2 = arith.constant 0 : index
    %1 = vector.load %arg3[%c0_1, %c0_2] : memref<32x128xbf16, #tpu.memory_space<vmem>>, vector<32x128xbf16>
    %cst = arith.constant dense<0.000000e+00> : vector<128x128xf32>
    %2 = tpu.matmul %0, %1, %cst {dimension_numbers = #tpu.dot_dimension_numbers<[1], [0], [0], [1], [0, 0, 1, 1], [], []>} : vector<128x32xbf16>, vector<32x128xbf16>, vector<128x128xf32> -> vector<128x128xf32>
    %3 = arith.truncf %2 : vector<128x128xf32> to vector<128x128xbf16>
    %c0_3 = arith.constant 0 : index
    %c0_4 = arith.constant 0 : index
    %4 = vector.load %arg4[%c0_3, %c0_4] : memref<128x128xbf16, #tpu.memory_space<vmem>>, vector<128x128xbf16>
    tpu.vector_store %arg4[%c0_3, %c0_4], %3 {strides = array<i32>} : memref<128x128xbf16, #tpu.memory_space<vmem>>, vector<128x128xbf16>,
    return
  }
  func.func @transform_0(%arg0: i32, %arg1: i32) -> (i32, i32) {
    %c0_i32 = arith.constant 0 : i32
    %c0_i32_0 = arith.constant 0 : i32
    return %arg0, %c0_i32 : i32, i32
  }
  func.func @transform_1(%arg0: i32, %arg1: i32) -> (i32, i32) {
    %c0_i32 = arith.constant 0 : i32
    %c0_i32_0 = arith.constant 0 : i32
    return %c0_i32, %arg1 : i32, i32
  }
  func.func @transform_2(%arg0: i32, %arg1: i32) -> (i32, i32) {
    %c0_i32 = arith.constant 0 : i32
    return %arg0, %arg1 : i32, i32
  }
}

</mosaic_0001>

<bundles_post_ra>
// kernel: tpu_custom_call.1
= control target key start
LH: loop header
LB: loop body
LE: loop exit
PB: predicated region body
PF: predicated region fallthrough
CT: control target
= control target key end

     0   :  { %vm85_vm0 = vcmask 261120   ;;  %s539_s0 = inlined_call_operand.vmem [shape: bf16[128,32], index: 0, kind: input, shape index: {}]   ;;  %s540_s1 = inlined_call_operand.vmem [shape: bf16[32,128], index: 1, kind: input, shape index: {}]   ;;  %s541_s2 = inlined_call_operand.hbm [shape: bf16[128,128], index: 2, kind: output, shape index: {}]  }
   0x1   :  { %v437_v0 = vld [vmem:[%s540_s1] sm:$0xff]   ;;  %v438_v1 = vld [vmem:[%s540_s1 + $0x8] sm:$0xff]   ;;  %v443_v6 = vld [vmem:[%s539_s0 + $0x10] sm:$0xff]  }
   0x2   :  { %410 = vmatprep.subr.bf16.mxu0 %v437_v0  ;;  %430 = vmatprep.subr.bf16.mxu1 %v437_v0  ;;  %v439_v2 = vld [vmem:[%s539_s0] sm:$0xff]   ;;  %v441_v4 = vld [vmem:[%s539_s0 + $0x8] sm:$0xff]   ;;  %v444_v7 = vld [vmem:[%s539_s0 + $0x30] sm:$0xff]  }
   0x3   :  { %411 = vmatpush3.bf16.msra.mxu0 %v437_v0  ;;  %432 = vmatpush3.bf16.msra.mxu1 %v437_v0  ;;  %v440_v3 = vld [vmem:[%s539_s0 + $0x20] sm:$0xff]   ;;  %v442_v5 = vld [vmem:[%s539_s0 + $0x28] sm:$0xff]  }
   0x4   :  { %412 = vmatprep.subr.bf16.mxu0 %v438_v1  ;;  %431 = vmatprep.subr.bf16.mxu1 %v438_v1 }
   0x5   :  { %414 = vmatprep.mubr.msk.bf16.mxu0 %vm85_vm0, %v439_v2  ;;  %422 = vmatprep.mubr.msk.bf16.mxu1 %vm85_vm0, %v440_v3 }
   0x7   :  { %413 = vmatpush3.bf16.msra.mxu0 %v438_v1  ;;  %433 = vmatpush3.bf16.msra.mxu1 %v438_v1 }
   0xa   :  { %415 = vmatmul.mubr.msk.bf16.vlgmr.msra.gmra.mrb[0].mxu0 %vm85_vm0, %v441_v4  ;;  %423 = vmatmul.mubr.msk.bf16.vlgmr.msra.gmra.mrb[0].mxu1 %vm85_vm0, %v442_v5 }
   0xb   :  { %7 = vsyncpa [#allocation3], 0  ;;  %418 = vmatprep.mubr.msk.bf16.mxu0 %vm85_vm0, %v443_v6  ;;  %426 = vmatprep.mubr.msk.bf16.mxu1 %vm85_vm0, %v444_v7  ;;  %v445_v8 = vld [vmem:[%s539_s0 + $0x18] sm:$0xff]  }
   0xc   :  { %v446_v9 = vld [vmem:[%s539_s0 + $0x38] sm:$0xff]   ;;  %s471_s0 = smov [#allocation2]  }
   0xd   :  { %s292_s28 = sshll.u32 %s471_s0, 4  ;;  %s293_s28 = int_to_ptr.vmem [resolvable:$true] %s292_s28 }
   0xe   :  { %s447_s29 = scalar_lea.vmem %s293_s28, 1024  ;;  %p452_p1 = scmp.lt.s32.totalorder %s293_s28, %s293_s28 }
   0xf   :  { %p448_p0 = scmp.ne.s32.totalorder %s293_s28, %s447_s29  ;;  %p453_p2 = scmp.lt.s32.totalorder %s447_s29, %s447_s29 }
  0x11   :  { %p454_p3 = por %p453_p2, %p452_p1 }
  0x12   :  { %419 = vmatmul.mubr.msk.bf16.gmra.mrb[4].mxu0 %vm85_vm0, %v445_v8  ;;  %427 = vmatmul.mubr.msk.bf16.gmra.mrb[4].mxu1 %vm85_vm0, %v446_v9 }
  0x13   :  { %p455_p4 = pnand %p454_p3, %p448_p0 }
  0xdd   :  { %v416_v10 = vpop.f32.mrb[0].mxu0  ;;  %v424_v11 = vpop.f32.mrb[0].mxu1 }
  0xde   :  { %v144_v12 = vpop.f32.mrb[1].mxu0  ;;  %v176_v13 = vpop.f32.mrb[1].mxu1 }
  0xdf   :  { %v417_v14 = vpop.f32.mrb[2].mxu0  ;;  %v425_v15 = vpop.f32.mrb[2].mxu1 }
  0xe0   :  { %v361_v16 = vpack.c.bf16 %v417_v14, %v416_v10  ;;  %v381_v17 = vpack.c.bf16 %v425_v15, %v424_v11  ;;  %v147_v18 = vpop.f32.mrb[3].mxu0  ;;  %v179_v19 = vpop.f32.mrb[3].mxu1 }
  0xe1   :  { %v356_v20 = vpack.c.bf16 %v147_v18, %v144_v12  ;;  %v376_v21 = vpack.c.bf16 %v179_v19, %v176_v13 }
  0xe2   :  { %393 = vst [vmem:[#allocation2 + $0x8] sm:$0xff] %v361_v16   ;;  %397 = vst [vmem:[#allocation2 + $0x28] sm:$0xff] %v381_v17  }
  0xe3   :  { %357 = vst [vmem:[#allocation2] sm:$0xff] %v356_v20   ;;  %396 = vst [vmem:[#allocation2 + $0x20] sm:$0xff] %v376_v21  }
  0xe5   :  { %v420_v22 = vpop.f32.mrb[4].mxu0  ;;  %v428_v23 = vpop.f32.mrb[4].mxu1 }
  0xe6   :  { %v160_v24 = vpop.f32.mrb[5].mxu0  ;;  %v192_v25 = vpop.f32.mrb[5].mxu1 }
  0xe7   :  { %v421_v26 = vpop.f32.mrb[6].mxu0  ;;  %v429_v27 = vpop.f32.mrb[6].mxu1 }
  0xe8   :  { %v371_v28 = vpack.c.bf16 %v421_v26, %v420_v22  ;;  %v391_v29 = vpack.c.bf16 %v429_v27, %v428_v23  ;;  %v163_v30 = vpop.f32.mrb[7].mxu0  ;;  %v195_v31 = vpop.f32.mrb[7].mxu1 }
  0xe9   :  { %v366_v32 = vpack.c.bf16 %v163_v30, %v160_v24  ;;  %v386_v33 = vpack.c.bf16 %v195_v31, %v192_v25 }
  0xea   :  { %395 = vst [vmem:[#allocation2 + $0x18] sm:$0xff] %v371_v28   ;;  %399 = vst [vmem:[#allocation2 + $0x38] sm:$0xff] %v391_v29  }
  0xeb   :  { %394 = vst [vmem:[#allocation2 + $0x10] sm:$0xff] %v366_v32   ;;  %398 = vst [vmem:[#allocation2 + $0x30] sm:$0xff] %v386_v33  }
  0xec   :  { %458 = shalt.err (!%p455_p4)
}
  0xed   :  { %s459_s4 = scalar_lea.hbm %s541_s2, 1024 }
  0xee   :  { %p460_p5 = scmp.ne.s32.totalorder %s541_s2, %s459_s4  ;;  %p463_p6 = scmp.lt.u32.totalorder %s459_s4, %s541_s2 }
  0xf0   :  { %p465_p7 = pnand %p463_p6, %p460_p5 }
  0xf2   :  { %468 = shalt.err (!%p465_p7)
}
  0xf3   :  { %s472_s9 = smov 64   ;;  %s473_s10 = smov 4  }
  0xf4   :  { %298 = dma.vmem_to_hbm [thread:$0]  %s293_s28, 1024, %s541_s2, [#allocation3], %s472_s9, %s472_s9, %s473_s10  }
  0xf5   :  { %469 = dma.done.wait [#allocation3], 1024  }
  0xf6   :  { %470 = vsyncadd [#allocation3], 4294966272 }
  0xf7   :  { %302 = vsyncpa [#allocation3], 1 }

</bundles_post_ra>
